<compile_context>
chip_gen: v7x
topology: tpu7x:2x2x1
jax: 0.10.0
libtpu: 0.0.40
codegen_flags: <defaults>
</compile_context>

<pallas_src>
import jax
import jax.numpy as jnp
from jax import lax
from jax.experimental import pallas as pl
from jax.experimental.pallas import tpu as pltpu


def actor_kernel(x_ref, wih_ref, whh_ref, b_ref,
                 w1_ref, b1_ref, w2_ref, b2_ref, out_ref):
    B, T, F_in = x_ref.shape
    H = whh_ref.shape[0]

    # ---- Hoisted input projection: one (B*T, 6) @ (6, 4H) matmul + bias. ----
    x_flat = x_ref[...].reshape(B * T, F_in).astype(jnp.bfloat16)
    pre = jnp.dot(x_flat, wih_ref[...], preferred_element_type=jnp.float32)
    pre = (pre + b_ref[...]).reshape(B, T, 4 * H)          # (B, T, 4H) f32

    whh = whh_ref[...]                                      # (H, 4H) bf16

    h = jnp.zeros((B, H), jnp.float32)
    c = jnp.zeros((B, H), jnp.float32)

    # ---- Recurrence: statically unrolled (T is small & static). ----
    # Per step only the h @ W_hh matmul (bf16 operands, f32 accumulate) sits on
    # the serial critical path.
    for t in range(T):
        gates = pre[:, t, :] + jnp.dot(h.astype(jnp.bfloat16), whh,
                                       preferred_element_type=jnp.float32)  # (B, 4H)
        # Full-width activations: one 128-lane sigmoid + one 128-lane tanh on
        # the EUP, then 32-lane slices only for the cheap state update.
        sig = jax.nn.sigmoid(gates)
        th = jnp.tanh(gates)
        i_g = sig[:, 0 * H:1 * H]
        f_g = sig[:, 1 * H:2 * H]
        g_g = th[:, 2 * H:3 * H]
        o_g = sig[:, 3 * H:4 * H]
        c = f_g * c + i_g * g_g
        h = o_g * jnp.tanh(c)

    # ---- proj: Linear(H, H) -> ReLU -> Linear(H, 3) -> softmax. ----
    z = jnp.dot(h, w1_ref[...], preferred_element_type=jnp.float32) + b1_ref[...]
    z = jnp.maximum(z, 0.0)
    logits = jnp.dot(z, w2_ref[...], preferred_element_type=jnp.float32) + b2_ref[...]

    m = jnp.max(logits, axis=-1, keepdims=True)
    e = jnp.exp(logits - m)
    out_ref[...] = e / jnp.sum(e, axis=-1, keepdims=True)


def xavier_uniform(key, shape, fan_in, fan_out, dtype=jnp.float32):
    bound = (6.0 / (fan_in + fan_out)) ** 0.5
    return jax.random.uniform(key, shape, dtype, minval=-bound, maxval=bound)


def init_actor_params(key, hidden):
    H = hidden
    k = jax.random.split(key, 4)
    # PyTorch layouts: W_ih (4H, 6), W_hh (4H, H), proj.0 (H, H), proj.2 (3, H)
    w_ih = xavier_uniform(k[0], (4 * H, 6), 6, 4 * H)
    w_hh = xavier_uniform(k[1], (4 * H, H), H, 4 * H)
    w1 = xavier_uniform(k[2], (H, H), H, H)
    w2 = xavier_uniform(k[3], (3, H), H, 3)
    # Biases (dim == 1) are not re-initialized by `initialize()`; use zeros
    # for determinism (PyTorch default is a small uniform).
    b_ih = jnp.zeros((4 * H,), jnp.float32)
    b_hh = jnp.zeros((4 * H,), jnp.float32)
    b1 = jnp.zeros((H,), jnp.float32)
    b2 = jnp.zeros((3,), jnp.float32)
    return dict(w_ih=w_ih, w_hh=w_hh, b_ih=b_ih, b_hh=b_hh,
                w1=w1, b1=b1, w2=w2, b2=b2)


def prepare_actor_params(params):
    """One-time layout work: transposes, bias fold, bf16 cast for MXU operands.

    Done once at init so the per-call hot path is a single pallas_call.
    """
    H = params["w_hh"].shape[1]
    return dict(
        wih_t=params["w_ih"].T.astype(jnp.bfloat16),                     # (6, 4H)
        whh_t=params["w_hh"].T.astype(jnp.bfloat16),                     # (H, 4H)
        bias=(params["b_ih"] + params["b_hh"]).reshape(1, 4 * H).astype(jnp.float32),
        w1_t=params["w1"].T.astype(jnp.float32),                         # (H, H)
        b1=params["b1"].reshape(1, H).astype(jnp.float32),
        w2_t=params["w2"].T.astype(jnp.float32),                         # (H, 3)
        b2=params["b2"].reshape(1, 3).astype(jnp.float32),
    )


def actor_forward(x_btf, prep):
    """x_btf: (B, T, 6) -> (B, 3) softmax probs. Single grid-less pallas_call.

    Total resident data ~20 KB: whole-array VMEM BlockSpecs, no grid/tiling
    needed on any TPU generation. (A batch-parallel grid only pays off at
    production batch sizes on v7x's second TensorCore.)
    """
    x = x_btf.astype(jnp.float32)              # mirrors `x = x.float()`
    B = x.shape[0]
    vmem = pl.BlockSpec(memory_space=pltpu.MemorySpace.VMEM)
    return pl.pallas_call(
        actor_kernel,
        out_shape=jax.ShapeDtypeStruct((B, 3), jnp.float32),
        in_specs=[vmem] * 8,
        out_specs=vmem,
    )(x, prep["wih_t"], prep["whh_t"], prep["bias"],
      prep["w1_t"], prep["b1"], prep["w2_t"], prep["b2"])


def actor_reference(x_btf, params):
    """Pure-JAX f32 reference of the PyTorch forward (non-packed branch)."""
    x = x_btf.astype(jnp.float32)
    B, T, _ = x.shape
    H = params["w_hh"].shape[1]
    wih_t = params["w_ih"].T
    whh_t = params["w_hh"].T
    bias = params["b_ih"] + params["b_hh"]

    def step(carry, xt):
        h, c = carry
        g = xt @ wih_t + h @ whh_t + bias
        i = jax.nn.sigmoid(g[:, 0 * H:1 * H])
        f = jax.nn.sigmoid(g[:, 1 * H:2 * H])
        gg = jnp.tanh(g[:, 2 * H:3 * H])
        o = jax.nn.sigmoid(g[:, 3 * H:4 * H])
        c = f * c + i * gg
        h = o * jnp.tanh(c)
        return (h, c), None

    (h, _), _ = lax.scan(step, (jnp.zeros((B, H)), jnp.zeros((B, H))),
                         jnp.transpose(x, (1, 0, 2)))
    z = jnp.maximum(h @ params["w1"].T + params["b1"], 0.0)
    logits = z @ params["w2"].T + params["b2"]
    return jax.nn.softmax(logits, axis=-1)


if __name__ == "__main__":
    HIDDEN = 32
    B, T = 2, 8

    key = jax.random.PRNGKey(0)
    k_param, k_x = jax.random.split(key)
    params = init_actor_params(k_param, HIDDEN)
    prep = prepare_actor_params(params)
    x = jax.random.normal(k_x, (B, T, 6), jnp.float32)

    forward = jax.jit(actor_forward)
    out = forward(x, prep)
    out = jax.block_until_ready(out)

    ref = actor_reference(x, params)
    assert out.shape == (B, 3)
    # Exact-division softmax: rows sum to 1 to fp precision.
    assert jnp.allclose(jnp.sum(out, axis=-1), 1.0, atol=1e-5)
    # bf16 MXU operands in the recurrence (f32 accumulation) vs. the pure-f32
    # reference: tolerance loosened accordingly.
    assert jnp.allclose(out, ref, atol=1e-2, rtol=1e-2), (
        f"max abs err {jnp.max(jnp.abs(out - ref)):.3e}")
    print("KERNEL_OK")
</pallas_src>

<mosaic_0001>
module attributes {stable_mosaic.version = 11 : i64} {
  func.func @actor_kernel(%arg0: memref<2x8x6xf32, #tpu.memory_space<vmem>>, %arg1: memref<6x128xbf16, #tpu.memory_space<vmem>>, %arg2: memref<32x128xbf16, #tpu.memory_space<vmem>>, %arg3: memref<1x128xf32, #tpu.memory_space<vmem>>, %arg4: memref<32x32xf32, #tpu.memory_space<vmem>>, %arg5: memref<1x32xf32, #tpu.memory_space<vmem>>, %arg6: memref<32x3xf32, #tpu.memory_space<vmem>>, %arg7: memref<1x3xf32, #tpu.memory_space<vmem>>, %arg8: memref<2x3xf32, #tpu.memory_space<vmem>>) attributes {dimension_semantics = [], scalar_prefetch = 0 : i64, scratch_operands = 0 : i64, tpu.core_type = #tpu.core_type<tc>} {
    %c0 = arith.constant 0 : index
    %c0_0 = arith.constant 0 : index
    %c0_1 = arith.constant 0 : index
    %0 = vector.load %arg0[%c0, %c0_0, %c0_1] : memref<2x8x6xf32, #tpu.memory_space<vmem>>, vector<2x8x6xf32>
    %1 = vector.shape_cast %0 : vector<2x8x6xf32> to vector<16x6xf32>
    %2 = arith.truncf %1 : vector<16x6xf32> to vector<16x6xbf16>
    %c0_2 = arith.constant 0 : index
    %c0_3 = arith.constant 0 : index
    %3 = vector.load %arg1[%c0_2, %c0_3] : memref<6x128xbf16, #tpu.memory_space<vmem>>, vector<6x128xbf16>
    %cst = arith.constant dense<0.000000e+00> : vector<16x128xf32>
    %4 = tpu.matmul %2, %3, %cst {dimension_numbers = #tpu.dot_dimension_numbers<[1], [0], [0], [1], [0, 0, 1, 1], [], []>} : vector<16x6xbf16>, vector<6x128xbf16>, vector<16x128xf32> -> vector<16x128xf32>
    %c0_4 = arith.constant 0 : index
    %c0_5 = arith.constant 0 : index
    %5 = vector.load %arg3[%c0_4, %c0_5] : memref<1x128xf32, #tpu.memory_space<vmem>>, vector<1x128xf32>
    %6 = vector.broadcast %5 : vector<1x128xf32> to vector<16x128xf32>
    %7 = arith.addf %4, %6 : vector<16x128xf32>
    %8 = vector.shape_cast %7 : vector<16x128xf32> to vector<2x8x128xf32>
    %c0_6 = arith.constant 0 : index
    %c0_7 = arith.constant 0 : index
    %9 = vector.load %arg2[%c0_6, %c0_7] : memref<32x128xbf16, #tpu.memory_space<vmem>>, vector<32x128xbf16>
    %cst_8 = arith.constant 0.000000e+00 : f32
    %10 = vector.broadcast %cst_8 : f32 to vector<2x32xf32>
    %cst_9 = arith.constant 0.000000e+00 : f32
    %11 = vector.broadcast %cst_9 : f32 to vector<2x32xf32>
    %12 = vector.extract_strided_slice %8 {offsets = [0, 0, 0], sizes = [2, 1, 128], strides = [1, 1, 1]} : vector<2x8x128xf32> to vector<2x1x128xf32>
    %13 = vector.shape_cast %12 : vector<2x1x128xf32> to vector<2x128xf32>
    %14 = arith.truncf %10 : vector<2x32xf32> to vector<2x32xbf16>
    %cst_10 = arith.constant dense<0.000000e+00> : vector<2x128xf32>
    %15 = tpu.matmul %14, %9, %cst_10 {dimension_numbers = #tpu.dot_dimension_numbers<[1], [0], [0], [1], [0, 0, 1, 1], [], []>} : vector<2x32xbf16>, vector<32x128xbf16>, vector<2x128xf32> -> vector<2x128xf32>
    %16 = arith.addf %13, %15 : vector<2x128xf32>
    %17 = arith.negf %16 : vector<2x128xf32>
    %18 = math.exp %17 : vector<2x128xf32>
    %cst_11 = arith.constant 1.000000e+00 : f32
    %19 = vector.broadcast %cst_11 : f32 to vector<2x128xf32>
    %20 = arith.addf %19, %18 : vector<2x128xf32>
    %21 = arith.divf %19, %20 : vector<2x128xf32>
    %22 = math.tanh %16 : vector<2x128xf32>
    %23 = vector.extract_strided_slice %21 {offsets = [0, 0], sizes = [2, 32], strides = [1, 1]} : vector<2x128xf32> to vector<2x32xf32>
    %24 = vector.extract_strided_slice %21 {offsets = [0, 32], sizes = [2, 32], strides = [1, 1]} : vector<2x128xf32> to vector<2x32xf32>
    %25 = vector.extract_strided_slice %22 {offsets = [0, 64], sizes = [2, 32], strides = [1, 1]} : vector<2x128xf32> to vector<2x32xf32>
    %26 = vector.extract_strided_slice %21 {offsets = [0, 96], sizes = [2, 32], strides = [1, 1]} : vector<2x128xf32> to vector<2x32xf32>
    %27 = arith.mulf %24, %11 : vector<2x32xf32>
    %28 = arith.mulf %23, %25 : vector<2x32xf32>
    %29 = arith.addf %27, %28 : vector<2x32xf32>
    %30 = math.tanh %29 : vector<2x32xf32>
    %31 = arith.mulf %26, %30 : vector<2x32xf32>
    %32 = vector.extract_strided_slice %8 {offsets = [0, 1, 0], sizes = [2, 1, 128], strides = [1, 1, 1]} : vector<2x8x128xf32> to vector<2x1x128xf32>
    %33 = vector.shape_cast %32 : vector<2x1x128xf32> to vector<2x128xf32>
    %34 = arith.truncf %31 : vector<2x32xf32> to vector<2x32xbf16>
    %cst_12 = arith.constant dense<0.000000e+00> : vector<2x128xf32>
    %35 = tpu.matmul %34, %9, %cst_12 {dimension_numbers = #tpu.dot_dimension_numbers<[1], [0], [0], [1], [0, 0, 1, 1], [], []>} : vector<2x32xbf16>, vector<32x128xbf16>, vector<2x128xf32> -> vector<2x128xf32>
    %36 = arith.addf %33, %35 : vector<2x128xf32>
    %37 = arith.negf %36 : vector<2x128xf32>
    %38 = math.exp %37 : vector<2x128xf32>
    %cst_13 = arith.constant 1.000000e+00 : f32
    %39 = vector.broadcast %cst_13 : f32 to vector<2x128xf32>
    %40 = arith.addf %39, %38 : vector<2x128xf32>
    %41 = arith.divf %39, %40 : vector<2x128xf32>
    %42 = math.tanh %36 : vector<2x128xf32>
    %43 = vector.extract_strided_slice %41 {offsets = [0, 0], sizes = [2, 32], strides = [1, 1]} : vector<2x128xf32> to vector<2x32xf32>
    %44 = vector.extract_strided_slice %41 {offsets = [0, 32], sizes = [2, 32], strides = [1, 1]} : vector<2x128xf32> to vector<2x32xf32>
    %45 = vector.extract_strided_slice %42 {offsets = [0, 64], sizes = [2, 32], strides = [1, 1]} : vector<2x128xf32> to vector<2x32xf32>
    %46 = vector.extract_strided_slice %41 {offsets = [0, 96], sizes = [2, 32], strides = [1, 1]} : vector<2x128xf32> to vector<2x32xf32>
    %47 = arith.mulf %44, %29 : vector<2x32xf32>
    %48 = arith.mulf %43, %45 : vector<2x32xf32>
    %49 = arith.addf %47, %48 : vector<2x32xf32>
    %50 = math.tanh %49 : vector<2x32xf32>
    %51 = arith.mulf %46, %50 : vector<2x32xf32>
    %52 = vector.extract_strided_slice %8 {offsets = [0, 2, 0], sizes = [2, 1, 128], strides = [1, 1, 1]} : vector<2x8x128xf32> to vector<2x1x128xf32>
    %53 = vector.shape_cast %52 : vector<2x1x128xf32> to vector<2x128xf32>
    %54 = arith.truncf %51 : vector<2x32xf32> to vector<2x32xbf16>
    %cst_14 = arith.constant dense<0.000000e+00> : vector<2x128xf32>
    %55 = tpu.matmul %54, %9, %cst_14 {dimension_numbers = #tpu.dot_dimension_numbers<[1], [0], [0], [1], [0, 0, 1, 1], [], []>} : vector<2x32xbf16>, vector<32x128xbf16>, vector<2x128xf32> -> vector<2x128xf32>
    %56 = arith.addf %53, %55 : vector<2x128xf32>
    %57 = arith.negf %56 : vector<2x128xf32>
    %58 = math.exp %57 : vector<2x128xf32>
    %cst_15 = arith.constant 1.000000e+00 : f32
    %59 = vector.broadcast %cst_15 : f32 to vector<2x128xf32>
    %60 = arith.addf %59, %58 : vector<2x128xf32>
    %61 = arith.divf %59, %60 : vector<2x128xf32>
    %62 = math.tanh %56 : vector<2x128xf32>
    %63 = vector.extract_strided_slice %61 {offsets = [0, 0], sizes = [2, 32], strides = [1, 1]} : vector<2x128xf32> to vector<2x32xf32>
    %64 = vector.extract_strided_slice %61 {offsets = [0, 32], sizes = [2, 32], strides = [1, 1]} : vector<2x128xf32> to vector<2x32xf32>
    %65 = vector.extract_strided_slice %62 {offsets = [0, 64], sizes = [2, 32], strides = [1, 1]} : vector<2x128xf32> to vector<2x32xf32>
    %66 = vector.extract_strided_slice %61 {offsets = [0, 96], sizes = [2, 32], strides = [1, 1]} : vector<2x128xf32> to vector<2x32xf32>
    %67 = arith.mulf %64, %49 : vector<2x32xf32>
    %68 = arith.mulf %63, %65 : vector<2x32xf32>
    %69 = arith.addf %67, %68 : vector<2x32xf32>
    %70 = math.tanh %69 : vector<2x32xf32>
    %71 = arith.mulf %66, %70 : vector<2x32xf32>
    %72 = vector.extract_strided_slice %8 {offsets = [0, 3, 0], sizes = [2, 1, 128], strides = [1, 1, 1]} : vector<2x8x128xf32> to vector<2x1x128xf32>
    %73 = vector.shape_cast %72 : vector<2x1x128xf32> to vector<2x128xf32>
    %74 = arith.truncf %71 : vector<2x32xf32> to vector<2x32xbf16>
    %cst_16 = arith.constant dense<0.000000e+00> : vector<2x128xf32>
    %75 = tpu.matmul %74, %9, %cst_16 {dimension_numbers = #tpu.dot_dimension_numbers<[1], [0], [0], [1], [0, 0, 1, 1], [], []>} : vector<2x32xbf16>, vector<32x128xbf16>, vector<2x128xf32> -> vector<2x128xf32>
    %76 = arith.addf %73, %75 : vector<2x128xf32>
    %77 = arith.negf %76 : vector<2x128xf32>
    %78 = math.exp %77 : vector<2x128xf32>
    %cst_17 = arith.constant 1.000000e+00 : f32
    %79 = vector.broadcast %cst_17 : f32 to vector<2x128xf32>
    %80 = arith.addf %79, %78 : vector<2x128xf32>
    %81 = arith.divf %79, %80 : vector<2x128xf32>
    %82 = math.tanh %76 : vector<2x128xf32>
    %83 = vector.extract_strided_slice %81 {offsets = [0, 0], sizes = [2, 32], strides = [1, 1]} : vector<2x128xf32> to vector<2x32xf32>
    %84 = vector.extract_strided_slice %81 {offsets = [0, 32], sizes = [2, 32], strides = [1, 1]} : vector<2x128xf32> to vector<2x32xf32>
    %85 = vector.extract_strided_slice %82 {offsets = [0, 64], sizes = [2, 32], strides = [1, 1]} : vector<2x128xf32> to vector<2x32xf32>
    %86 = vector.extract_strided_slice %81 {offsets = [0, 96], sizes = [2, 32], strides = [1, 1]} : vector<2x128xf32> to vector<2x32xf32>
    %87 = arith.mulf %84, %69 : vector<2x32xf32>
    %88 = arith.mulf %83, %85 : vector<2x32xf32>
    %89 = arith.addf %87, %88 : vector<2x32xf32>
    %90 = math.tanh %89 : vector<2x32xf32>
    %91 = arith.mulf %86, %90 : vector<2x32xf32>
    %92 = vector.extract_strided_slice %8 {offsets = [0, 4, 0], sizes = [2, 1, 128], strides = [1, 1, 1]} : vector<2x8x128xf32> to vector<2x1x128xf32>
    %93 = vector.shape_cast %92 : vector<2x1x128xf32> to vector<2x128xf32>
    %94 = arith.truncf %91 : vector<2x32xf32> to vector<2x32xbf16>
    %cst_18 = arith.constant dense<0.000000e+00> : vector<2x128xf32>
    %95 = tpu.matmul %94, %9, %cst_18 {dimension_numbers = #tpu.dot_dimension_numbers<[1], [0], [0], [1], [0, 0, 1, 1], [], []>} : vector<2x32xbf16>, vector<32x128xbf16>, vector<2x128xf32> -> vector<2x128xf32>
    %96 = arith.addf %93, %95 : vector<2x128xf32>
    %97 = arith.negf %96 : vector<2x128xf32>
    %98 = math.exp %97 : vector<2x128xf32>
    %cst_19 = arith.constant 1.000000e+00 : f32
    %99 = vector.broadcast %cst_19 : f32 to vector<2x128xf32>
    %100 = arith.addf %99, %98 : vector<2x128xf32>
    %101 = arith.divf %99, %100 : vector<2x128xf32>
    %102 = math.tanh %96 : vector<2x128xf32>
    %103 = vector.extract_strided_slice %101 {offsets = [0, 0], sizes = [2, 32], strides = [1, 1]} : vector<2x128xf32> to vector<2x32xf32>
    %104 = vector.extract_strided_slice %101 {offsets = [0, 32], sizes = [2, 32], strides = [1, 1]} : vector<2x128xf32> to vector<2x32xf32>
    %105 = vector.extract_strided_slice %102 {offsets = [0, 64], sizes = [2, 32], strides = [1, 1]} : vector<2x128xf32> to vector<2x32xf32>
    %106 = vector.extract_strided_slice %101 {offsets = [0, 96], sizes = [2, 32], strides = [1, 1]} : vector<2x128xf32> to vector<2x32xf32>
    %107 = arith.mulf %104, %89 : vector<2x32xf32>
    %108 = arith.mulf %103, %105 : vector<2x32xf32>
    %109 = arith.addf %107, %108 : vector<2x32xf32>
    %110 = math.tanh %109 : vector<2x32xf32>
    %111 = arith.mulf %106, %110 : vector<2x32xf32>
    %112 = vector.extract_strided_slice %8 {offsets = [0, 5, 0], sizes = [2, 1, 128], strides = [1, 1, 1]} : vector<2x8x128xf32> to vector<2x1x128xf32>
    %113 = vector.shape_cast %112 : vector<2x1x128xf32> to vector<2x128xf32>
    %114 = arith.truncf %111 : vector<2x32xf32> to vector<2x32xbf16>
    %cst_20 = arith.constant dense<0.000000e+00> : vector<2x128xf32>
    %115 = tpu.matmul %114, %9, %cst_20 {dimension_numbers = #tpu.dot_dimension_numbers<[1], [0], [0], [1], [0, 0, 1, 1], [], []>} : vector<2x32xbf16>, vector<32x128xbf16>, vector<2x128xf32> -> vector<2x128xf32>
    %116 = arith.addf %113, %115 : vector<2x128xf32>
    %117 = arith.negf %116 : vector<2x128xf32>
    %118 = math.exp %117 : vector<2x128xf32>
    %cst_21 = arith.constant 1.000000e+00 : f32
    %119 = vector.broadcast %cst_21 : f32 to vector<2x128xf32>
    %120 = arith.addf %119, %118 : vector<2x128xf32>
    %121 = arith.divf %119, %120 : vector<2x128xf32>
    %122 = math.tanh %116 : vector<2x128xf32>
    %123 = vector.extract_strided_slice %121 {offsets = [0, 0], sizes = [2, 32], strides = [1, 1]} : vector<2x128xf32> to vector<2x32xf32>
    %124 = vector.extract_strided_slice %121 {offsets = [0, 32], sizes = [2, 32], strides = [1, 1]} : vector<2x128xf32> to vector<2x32xf32>
    %125 = vector.extract_strided_slice %122 {offsets = [0, 64], sizes = [2, 32], strides = [1, 1]} : vector<2x128xf32> to vector<2x32xf32>
    %126 = vector.extract_strided_slice %121 {offsets = [0, 96], sizes = [2, 32], strides = [1, 1]} : vector<2x128xf32> to vector<2x32xf32>
    %127 = arith.mulf %124, %109 : vector<2x32xf32>
    %128 = arith.mulf %123, %125 : vector<2x32xf32>
    %129 = arith.addf %127, %128 : vector<2x32xf32>
    %130 = math.tanh %129 : vector<2x32xf32>
    %131 = arith.mulf %126, %130 : vector<2x32xf32>
    %132 = vector.extract_strided_slice %8 {offsets = [0, 6, 0], sizes = [2, 1, 128], strides = [1, 1, 1]} : vector<2x8x128xf32> to vector<2x1x128xf32>
    %133 = vector.shape_cast %132 : vector<2x1x128xf32> to vector<2x128xf32>
    %134 = arith.truncf %131 : vector<2x32xf32> to vector<2x32xbf16>
    %cst_22 = arith.constant dense<0.000000e+00> : vector<2x128xf32>
    %135 = tpu.matmul %134, %9, %cst_22 {dimension_numbers = #tpu.dot_dimension_numbers<[1], [0], [0], [1], [0, 0, 1, 1], [], []>} : vector<2x32xbf16>, vector<32x128xbf16>, vector<2x128xf32> -> vector<2x128xf32>
    %136 = arith.addf %133, %135 : vector<2x128xf32>
    %137 = arith.negf %136 : vector<2x128xf32>
    %138 = math.exp %137 : vector<2x128xf32>
    %cst_23 = arith.constant 1.000000e+00 : f32
    %139 = vector.broadcast %cst_23 : f32 to vector<2x128xf32>
    %140 = arith.addf %139, %138 : vector<2x128xf32>
    %141 = arith.divf %139, %140 : vector<2x128xf32>
    %142 = math.tanh %136 : vector<2x128xf32>
    %143 = vector.extract_strided_slice %141 {offsets = [0, 0], sizes = [2, 32], strides = [1, 1]} : vector<2x128xf32> to vector<2x32xf32>
    %144 = vector.extract_strided_slice %141 {offsets = [0, 32], sizes = [2, 32], strides = [1, 1]} : vector<2x128xf32> to vector<2x32xf32>
    %145 = vector.extract_strided_slice %142 {offsets = [0, 64], sizes = [2, 32], strides = [1, 1]} : vector<2x128xf32> to vector<2x32xf32>
    %146 = vector.extract_strided_slice %141 {offsets = [0, 96], sizes = [2, 32], strides = [1, 1]} : vector<2x128xf32> to vector<2x32xf32>
    %147 = arith.mulf %144, %129 : vector<2x32xf32>
    %148 = arith.mulf %143, %145 : vector<2x32xf32>
    %149 = arith.addf %147, %148 : vector<2x32xf32>
    %150 = math.tanh %149 : vector<2x32xf32>
    %151 = arith.mulf %146, %150 : vector<2x32xf32>
    %152 = vector.extract_strided_slice %8 {offsets = [0, 7, 0], sizes = [2, 1, 128], strides = [1, 1, 1]} : vector<2x8x128xf32> to vector<2x1x128xf32>
    %153 = vector.shape_cast %152 : vector<2x1x128xf32> to vector<2x128xf32>
    %154 = arith.truncf %151 : vector<2x32xf32> to vector<2x32xbf16>
    %cst_24 = arith.constant dense<0.000000e+00> : vector<2x128xf32>
    %155 = tpu.matmul %154, %9, %cst_24 {dimension_numbers = #tpu.dot_dimension_numbers<[1], [0], [0], [1], [0, 0, 1, 1], [], []>} : vector<2x32xbf16>, vector<32x128xbf16>, vector<2x128xf32> -> vector<2x128xf32>
    %156 = arith.addf %153, %155 : vector<2x128xf32>
    %157 = arith.negf %156 : vector<2x128xf32>
    %158 = math.exp %157 : vector<2x128xf32>
    %cst_25 = arith.constant 1.000000e+00 : f32
    %159 = vector.broadcast %cst_25 : f32 to vector<2x128xf32>
    %160 = arith.addf %159, %158 : vector<2x128xf32>
    %161 = arith.divf %159, %160 : vector<2x128xf32>
    %162 = math.tanh %156 : vector<2x128xf32>
    %163 = vector.extract_strided_slice %161 {offsets = [0, 0], sizes = [2, 32], strides = [1, 1]} : vector<2x128xf32> to vector<2x32xf32>
    %164 = vector.extract_strided_slice %161 {offsets = [0, 32], sizes = [2, 32], strides = [1, 1]} : vector<2x128xf32> to vector<2x32xf32>
    %165 = vector.extract_strided_slice %162 {offsets = [0, 64], sizes = [2, 32], strides = [1, 1]} : vector<2x128xf32> to vector<2x32xf32>
    %166 = vector.extract_strided_slice %161 {offsets = [0, 96], sizes = [2, 32], strides = [1, 1]} : vector<2x128xf32> to vector<2x32xf32>
    %167 = arith.mulf %164, %149 : vector<2x32xf32>
    %168 = arith.mulf %163, %165 : vector<2x32xf32>
    %169 = arith.addf %167, %168 : vector<2x32xf32>
    %170 = math.tanh %169 : vector<2x32xf32>
    %171 = arith.mulf %166, %170 : vector<2x32xf32>
    %c0_26 = arith.constant 0 : index
    %c0_27 = arith.constant 0 : index
    %172 = vector.load %arg4[%c0_26, %c0_27] : memref<32x32xf32, #tpu.memory_space<vmem>>, vector<32x32xf32>
    %cst_28 = arith.constant dense<0.000000e+00> : vector<2x32xf32>
    %173 = tpu.matmul %171, %172, %cst_28 {dimension_numbers = #tpu.dot_dimension_numbers<[1], [0], [0], [1], [0, 0, 1, 1], [], []>} : vector<2x32xf32>, vector<32x32xf32>, vector<2x32xf32> -> vector<2x32xf32>
    %c0_29 = arith.constant 0 : index
    %c0_30 = arith.constant 0 : index
    %174 = vector.load %arg5[%c0_29, %c0_30] : memref<1x32xf32, #tpu.memory_space<vmem>>, vector<1x32xf32>
    %175 = vector.broadcast %174 : vector<1x32xf32> to vector<2x32xf32>
    %176 = arith.addf %173, %175 : vector<2x32xf32>
    %cst_31 = arith.constant 0.000000e+00 : f32
    %177 = vector.broadcast %cst_31 : f32 to vector<2x32xf32>
    %178 = arith.maximumf %176, %177 : vector<2x32xf32>
    %c0_32 = arith.constant 0 : index
    %c0_33 = arith.constant 0 : index
    %179 = vector.load %arg6[%c0_32, %c0_33] : memref<32x3xf32, #tpu.memory_space<vmem>>, vector<32x3xf32>
    %cst_34 = arith.constant dense<0.000000e+00> : vector<2x3xf32>
    %180 = tpu.matmul %178, %179, %cst_34 {dimension_numbers = #tpu.dot_dimension_numbers<[1], [0], [0], [1], [0, 0, 1, 1], [], []>} : vector<2x32xf32>, vector<32x3xf32>, vector<2x3xf32> -> vector<2x3xf32>
    %c0_35 = arith.constant 0 : index
    %c0_36 = arith.constant 0 : index
    %181 = vector.load %arg7[%c0_35, %c0_36] : memref<1x3xf32, #tpu.memory_space<vmem>>, vector<1x3xf32>
    %182 = vector.broadcast %181 : vector<1x3xf32> to vector<2x3xf32>
    %183 = arith.addf %180, %182 : vector<2x3xf32>
    %cst_37 = arith.constant dense<0xFF800000> : vector<2xf32>
    %184 = vector.multi_reduction <maximumf>, %183, %cst_37 [1] : vector<2x3xf32> to vector<2xf32>
    %185 = vector.shape_cast %184 : vector<2xf32> to vector<2x1xf32>
    %186 = vector.broadcast %185 : vector<2x1xf32> to vector<2x3xf32>
    %187 = arith.subf %183, %186 : vector<2x3xf32>
    %188 = math.exp %187 : vector<2x3xf32>
    %cst_38 = arith.constant dense<0.000000e+00> : vector<2xf32>
    %189 = vector.multi_reduction <add>, %188, %cst_38 [1] : vector<2x3xf32> to vector<2xf32>
    %190 = vector.shape_cast %189 : vector<2xf32> to vector<2x1xf32>
    %191 = vector.broadcast %190 : vector<2x1xf32> to vector<2x3xf32>
    %192 = arith.divf %188, %191 : vector<2x3xf32>
    %c0_39 = arith.constant 0 : index
    %c0_40 = arith.constant 0 : index
    %193 = vector.load %arg8[%c0_39, %c0_40] : memref<2x3xf32, #tpu.memory_space<vmem>>, vector<2x3xf32>
    tpu.vector_store %arg8[%c0_39, %c0_40], %192 {strides = array<i32>} : memref<2x3xf32, #tpu.memory_space<vmem>>, vector<2x3xf32>,
    return
  }
}

</mosaic_0001>

<bundles_post_ra>
// kernel: actor_forward.1
= control target key start
LH: loop header
LB: loop body
LE: loop exit
PB: predicated region body
PF: predicated region fallthrough
CT: control target
= control target key end

     0   :  { %vm46_vm0 = vcmask 1042432   ;;  %v1553_v1 = vmov 0.0   ;;  %vm1554_vm1 = vmmov 0   ;;  %vm42_vm2 = vcmask 48128   ;;  %s1840_s0 = inlined_call_operand.vmem [shape: f32[2,8,6], index: 0, kind: input, shape index: {}]   ;;  %s1841_s1 = inlined_call_operand.vmem [shape: bf16[6,128], index: 1, kind: input, shape index: {}]   ;;  %s1842_s2 = inlined_call_operand.vmem [shape: bf16[32,128], index: 2, kind: input, shape index: {}]   ;;  %s1843_s3 = inlined_call_operand.vmem [shape: f32[1,128], index: 3, kind: input, shape index: {}]   ;;  %s1844_s4 = inlined_call_operand.vmem [shape: f32[32,32], index: 4, kind: input, shape index: {}]   ;;  %s1845_s5 = inlined_call_operand.vmem [shape: f32[1,32], index: 5, kind: input, shape index: {}]   ;;  %s1846_s6 = inlined_call_operand.vmem [shape: f32[32,3], index: 6, kind: input, shape index: {}]   ;;  %s1847_s7 = inlined_call_operand.vmem [shape: f32[1,3], index: 7, kind: input, shape index: {}]   ;;  %s1848_s8 = inlined_call_operand.hbm [shape: f32[2,3], index: 8, kind: output, shape index: {}]  }
   0x1   :  { %v34_v0 = vld [vmem:[%s1841_s1] sm:$0x7]  ;;  %1284 = vmatprep.subr.bf16.mxu0 %v1553_v1  ;;  %1290 = vmatprep.subr.bf16.mxu1 %v1553_v1  ;;  %v32_v5 = vld [vmem:[%s1840_s0 + $0x8] sm:$0xff] }
   0x2   :  { %v48_v2 = vsel %vm46_vm0, %v34_v0, 0  ;;  %v1613_v3 = vld [vmem:[%s1842_s2] sm:$0xff]   ;;  %1286 = vmatprep.mubr.msk.bf16.mxu0 %vm1554_vm1, %v1553_v1  ;;  %v1627_v7 = vld [vmem:[%s1842_s2 + $0x8] sm:$0xff]   ;;  %1294 = vmatprep.mubr.msk.bf16.mxu1 %vm1554_vm1, %v1553_v1 }
   0x3   :  { %v31_v4 = vld [vmem:[%s1840_s0] sm:$0xff]  ;;  %1285 = vmatpush3.bf16.msra.mxu0 %v48_v2  ;;  %1291 = vmatpush3.bf16.msra.mxu1 %v1613_v3 }
   0x4   :  { %v33_v6 = vpack.c.bf16 %v32_v5, %v31_v4 }
   0x5   :  { %13 = vsyncpa [#allocation3], 0  ;;  %1292 = vmatprep.subr.bf16.mxu1 %v1553_v1  ;;  %1298 = vmatprep.subr.bf16.mxu0 %v1553_v1  ;;  %v1555_v8 = vmov 0   ;;  %v1217_v12 = vld [vmem:[%s1843_s3] ss:$0 sm:$0xff]  ;;  %s1556_s14 = smov 64  }
   0x6   :  { %1287 = vmatmul.mubr.msk.bf16.vlgmr.msra.gmra.mrb[0].mxu0 %vm42_vm2, %v33_v6  ;;  %s1557_s3 = smov 32   ;;  %vm212_vm3 = vcmask 1041409   ;;  %vm107_vm4 = vcmask 261120   ;;  %vm1190_vm5 = vcmask 17408  }
   0x7   :  { %1299 = vmatpush3.bf16.msra.mxu0 %v1613_v3  ;;  %1302 = vmatprep.mubr.msk.bf16.mxu0 %vm1554_vm1, %v1553_v1 }
   0x8   :  { %1293 = vmatpush3.bf16.msra.mxu1 %v1627_v7  ;;  %1300 = vmatprep.subr.bf16.mxu0 %v1553_v1 }
   0x9   :  { %1306 = vmatprep.subr.bf16.mxu1 %v1553_v1 }
   0xb   :  { %1295 = vmatmul.mubr.bf16.vlgmr.msra.gmra.mrb[0].mxu1 %v1555_v8  ;;  %1301 = vmatpush3.bf16.msra.mxu0 %v1627_v7 }
   0xc   :  { %1307 = vmatpush3.bf16.msra.mxu1 %v1613_v3  ;;  %1310 = vmatprep.mubr.msk.bf16.mxu1 %vm1554_vm1, %v1553_v1 }
   0xd   :  { %1308 = vmatprep.subr.bf16.mxu1 %v1553_v1  ;;  %1314 = vmatprep.subr.bf16.mxu0 %v1553_v1 }
  0x10   :  { %1309 = vmatpush3.bf16.msra.mxu1 %v1627_v7 }
  0x11   :  { %1322 = vmatprep.subr.bf16.mxu1 %v1553_v1 }
  0xd9   :  { %v84_v9 = vpop.f32.mrb[0].mxu0 }
  0xda   :  { %v1288_v10 = vpop.f32.mrb[1].mxu0  ;;  %v1652_v18 = vadd.f32 %v1217_v12, %v84_v9 }
  0xdb   :  { %v87_v11 = vpop.f32.mrb[2].mxu0 }
  0xdc   :  { %v1289_v13 = vpop.f32.mrb[3].mxu0  ;;  %v1650_v15 = vadd.f32 %v1217_v12, %v87_v11 }
  0xde   :  { %v145_v14 = vpop.f32.mrb[0].mxu1 }
  0xdf   :  { %v152_v16 = vrot.slane %v145_v14, 1  ;;  %v1296_v17 = vpop.f32.mrb[1].mxu1  ;;  %v155_v22 = vadd.f32 %v145_v14, %v1652_v18 }
  0xe0   :  { %v148_v19 = vpop.f32.mrb[2].mxu1 }
  0xe1   :  { %v156_v20 = vadd.f32 %v152_v16, %v1650_v15  ;;  %v1297_v21 = vpop.f32.mrb[3].mxu1  ;;  %v1221_v26 = vmul.f32 -1.442695, %v155_v22 }
  0xe3   :  { %1397 = vtanh.f32 %v156_v20  ;;  %v1222_v25 = vmul.f32 -1.442695, %v156_v20 }
  0xe4   :  { %1399 = vtanh.f32 %v155_v22 }
  0xe5   :  { %1401 = vpow2.f32 %v1222_v25 }
  0xe6   :  { %1403 = vpow2.f32 %v1221_v26 }
  0xed   :  { %v1398_v23 = vpop.eup %1397 }
  0xee   :  { %177 = vrot.lane.b32.xlu0 %v1398_v23, %s1556_s14  ;;  %v1400_v24 = vpop.eup %1399 }
  0xef   :  { %v1402_v27 = vpop.eup %1401 }
  0xf0   :  { %v164_v28 = vadd.f32 1.0, %v1402_v27  ;;  %v1404_v29 = vpop.eup %1403 }
  0xf1   :  { %v163_v30 = vadd.f32 1.0, %v1404_v29 }
  0xf2   :  { %175 = vrot.lane.b32.xlu0 %v1400_v24, %s1556_s14  ;;  %1405 = vrcp.f32 %v164_v28 }
  0xf3   :  { %1407 = vrcp.f32 %v163_v30 }
  0xfc   :  { %v1406_v31 = vpop.eup %1405 }
  0xfd   :  { %v1408_v34 = vpop.eup %1407  ;;  %v172_v37 = vmul.f32 0.0, %v1406_v31 }
  0xfe   :  { %v171_v40 = vmul.f32 0.0, %v1408_v34 }
 0x160   :  { %v178_v32 = vpop.permute.xlu0 %177 }
 0x161   :  { %v182_v33 = vmul.f32 %v1406_v31, %v178_v32 }
 0x163   :  { %187 = vrot.lane.b32.xlu1 %v182_v33, %s1557_s3 }
 0x164   :  { %v176_v35 = vpop.permute.xlu0 %175 }
 0x165   :  { %v181_v36 = vmul.f32 %v1408_v34, %v176_v35 }
 0x167   :  { %185 = vrot.lane.b32.xlu1 %v181_v36, %s1557_s3 }
 0x1d5   :  { %v188_v38 = vpop.permute.xlu1 %187 }
 0x1d6   :  { %v1660_v39 = vadd.f32 %v188_v38, %v172_v37 }
 0x1d8   :  { %1409 = vtanh.f32 %v1660_v39  ;;  %v283_v19 = vrot.slane %v1660_v39, 7 }
 0x1d9   :  { %v186_v41 = vpop.permute.xlu1 %185 }
 0x1da   :  { %v1663_v42 = vadd.f32 %v186_v41, %v171_v40 }
 0x1dc   :  { %1411 = vtanh.f32 %v1663_v42  ;;  %v282_v21 = vrot.slane %v1663_v42, 7 }
 0x1e2   :  { %v1410_v43 = vpop.eup %1409 }
 0x1e3   :  { %199 = vrot.lane.b32.xlu0 %v1410_v43, %s1556_s14 }
 0x1e6   :  { %v1412_v44 = vpop.eup %1411 }
 0x1e7   :  { %197 = vrot.lane.b32.xlu1 %v1412_v44, %s1556_s14 }
 0x255   :  { %v200_v45 = vpop.permute.xlu0 %199 }
 0x256   :  { %v204_v46 = vmul.f32 %v1406_v31, %v200_v45 }
 0x258   :  { %v206_v47 = vpack.c.bf16 %v204_v46, %v204_v46 }
 0x259   :  { %v198_v48 = vpop.permute.xlu1 %197 }
 0x25a   :  { %v210_v49 = vunpack.c.l.b16 %v206_v47  ;;  %v203_v50 = vmul.f32 %v1408_v34, %v198_v48 }
 0x25c   :  { %v205_v51 = vpack.c.bf16 %v203_v50, %v203_v50  ;;  %v211_v52 = vrot.slane %v210_v49, 7 }
 0x25e   :  { %v209_v53 = vunpack.c.l.b16 %v205_v51 }
 0x260   :  { %v213_v54 = vsel %vm212_vm3, %v211_v52, %v209_v53 }
 0x261   :  { %v214_v55 = vpack.c.b16 %v213_v54, %v213_v54 }
 0x263   :  { %215 = vrot.lane.b32.xlu0 %v214_v55, %s1557_s3 }
 0x2d5   :  { %v216_v56 = vpop.permute.xlu0 %215 }
 0x2d6   :  { %1303 = vmatmul.mubr.msk.bf16.vlgmr.msra.gmra.mrb[4].mxu0 %vm107_vm4, %v216_v56 }
 0x2d7   :  { %1315 = vmatpush3.bf16.msra.mxu0 %v1613_v3  ;;  %1318 = vmatprep.mubr.msk.bf16.mxu0 %vm1554_vm1, %v1553_v1 }
 0x2d8   :  { %1316 = vmatprep.subr.bf16.mxu0 %v1553_v1 }
 0x2db   :  { %1317 = vmatpush3.bf16.msra.mxu0 %v1627_v7 }
 0x2dc   :  { %1330 = vmatprep.subr.bf16.mxu0 %v1553_v1 }
 0x3a9   :  { %v254_v57 = vpop.f32.mrb[4].mxu0 }
 0x3aa   :  { %v261_v58 = vrot.slane %v254_v57, 7  ;;  %v265_v59 = vadd.f32 %v254_v57, %v1650_v15  ;;  %v1304_v60 = vpop.f32.mrb[5].mxu0 }
 0x3ab   :  { %v257_v61 = vpop.f32.mrb[6].mxu0 }
 0x3ac   :  { %v264_v62 = vadd.f32 %v261_v58, %v1652_v18  ;;  %1413 = vtanh.f32 %v265_v59  ;;  %v1305_v63 = vpop.f32.mrb[7].mxu0  ;;  %v1225_v4 = vmul.f32 -1.442695, %v265_v59 }
 0x3ae   :  { %1415 = vtanh.f32 %v264_v62  ;;  %v1224_v5 = vmul.f32 -1.442695, %v264_v62 }
 0x3af   :  { %1417 = vpow2.f32 %v1225_v4 }
 0x3b0   :  { %1419 = vpow2.f32 %v1224_v5 }
 0x3b6   :  { %v1414_v0 = vpop.eup %1413 }
 0x3b7   :  { %292 = vrot.lane.b32.xlu0 %v1414_v0, %s1556_s14 }
 0x3b8   :  { %v1416_v2 = vpop.eup %1415 }
 0x3b9   :  { %290 = vrot.lane.b32.xlu1 %v1416_v2, %s1556_s14  ;;  %v1418_v6 = vpop.eup %1417 }
 0x3ba   :  { %v1420_v8 = vpop.eup %1419  ;;  %v273_v9 = vadd.f32 1.0, %v1418_v6 }
 0x3bb   :  { %v272_v10 = vadd.f32 1.0, %v1420_v8 }
 0x3bc   :  { %1421 = vrcp.f32 %v273_v9 }
 0x3bd   :  { %1423 = vrcp.f32 %v272_v10 }
 0x3c6   :  { %v1422_v11 = vpop.eup %1421 }
 0x3c7   :  { %v1424_v14 = vpop.eup %1423  ;;  %v287_v20 = vmul.f32 %v1422_v11, %v283_v19 }
 0x3c8   :  { %v286_v24 = vmul.f32 %v1424_v14, %v282_v21 }
 0x429   :  { %v293_v12 = vpop.permute.xlu0 %292 }
 0x42a   :  { %v297_v13 = vmul.f32 %v1422_v11, %v293_v12 }
 0x42b   :  { %v291_v16 = vpop.permute.xlu1 %290 }
 0x42c   :  { %302 = vrot.lane.b32.xlu0 %v297_v13, %s1557_s3  ;;  %v296_v17 = vmul.f32 %v1424_v14, %v291_v16 }
 0x42e   :  { %300 = vrot.lane.b32.xlu1 %v296_v17, %s1557_s3 }
 0x49e   :  { %v303_v22 = vpop.permute.xlu0 %302 }
 0x49f   :  { %v1685_v23 = vadd.f32 %v303_v22, %v287_v20 }
 0x4a0   :  { %v301_v25 = vpop.permute.xlu1 %300 }
 0x4a1   :  { %1425 = vtanh.f32 %v1685_v23  ;;  %v306_v26 = vadd.f32 %v301_v25, %v286_v24  ;;  %v398_v0 = vrot.slane %v1685_v23, 7 }
 0x4a3   :  { %1427 = vtanh.f32 %v306_v26  ;;  %v397_v63 = vrot.slane %v306_v26, 7 }
 0x4ab   :  { %v1426_v27 = vpop.eup %1425 }
 0x4ac   :  { %314 = vrot.lane.b32.xlu0 %v1426_v27, %s1556_s14 }
 0x4ad   :  { %v1428_v28 = vpop.eup %1427 }
 0x4ae   :  { %312 = vrot.lane.b32.xlu1 %v1428_v28, %s1556_s14 }
 0x51e   :  { %v315_v29 = vpop.permute.xlu0 %314 }
 0x51f   :  { %v319_v30 = vmul.f32 %v1422_v11, %v315_v29 }
 0x520   :  { %v313_v31 = vpop.permute.xlu1 %312 }
 0x521   :  { %v318_v32 = vmul.f32 %v1424_v14, %v313_v31  ;;  %v321_v33 = vpack.c.bf16 %v319_v30, %v319_v30 }
 0x523   :  { %v320_v34 = vpack.c.bf16 %v318_v32, %v318_v32  ;;  %v325_v36 = vunpack.c.l.b16 %v321_v33 }
 0x525   :  { %v324_v35 = vunpack.c.l.b16 %v320_v34 }
 0x527   :  { %v326_v37 = vrot.slane %v324_v35, 1 }
 0x529   :  { %v327_v38 = vsel %vm212_vm3, %v325_v36, %v326_v37 }
 0x52a   :  { %v328_v39 = vpack.c.b16 %v327_v38, %v327_v38 }
 0x52c   :  { %329 = vrot.lane.b32.xlu1 %v328_v39, %s1557_s3 }
 0x59e   :  { %v330_v40 = vpop.permute.xlu1 %329 }
 0x59f   :  { %1311 = vmatmul.mubr.msk.bf16.vlgmr.msra.gmra.mrb[4].mxu1 %vm107_vm4, %v330_v40 }
 0x5a0   :  { %1323 = vmatpush3.bf16.msra.mxu1 %v1613_v3  ;;  %1326 = vmatprep.mubr.msk.bf16.mxu1 %vm1554_vm1, %v1553_v1 }
 0x5a1   :  { %1324 = vmatprep.subr.bf16.mxu1 %v1553_v1 }
 0x5a4   :  { %1325 = vmatpush3.bf16.msra.mxu1 %v1627_v7 }
 0x5a5   :  { %1338 = vmatprep.subr.bf16.mxu1 %v1553_v1 }
 0x672   :  { %v368_v41 = vpop.f32.mrb[4].mxu1 }
 0x673   :  { %v375_v42 = vrot.slane %v368_v41, 6  ;;  %v376_v43 = vrot.slane %v368_v41, 7  ;;  %v1312_v44 = vpop.f32.mrb[5].mxu1 }
 0x674   :  { %v371_v45 = vpop.f32.mrb[6].mxu1 }
 0x675   :  { %v379_v46 = vadd.f32 %v375_v42, %v1652_v18  ;;  %v380_v47 = vadd.f32 %v376_v43, %v1650_v15  ;;  %v1313_v48 = vpop.f32.mrb[7].mxu1 }
 0x677   :  { %1429 = vtanh.f32 %v379_v46  ;;  %v1227_v51 = vmul.f32 -1.442695, %v379_v46  ;;  %v1228_v52 = vmul.f32 -1.442695, %v380_v47 }
 0x678   :  { %1431 = vtanh.f32 %v380_v47 }
 0x679   :  { %1433 = vpow2.f32 %v1227_v51 }
 0x67a   :  { %1435 = vpow2.f32 %v1228_v52 }
 0x681   :  { %v1430_v49 = vpop.eup %1429 }
 0x682   :  { %v1432_v50 = vpop.eup %1431  ;;  %405 = vrot.lane.b32.xlu0 %v1430_v49, %s1556_s14 }
 0x683   :  { %407 = vrot.lane.b32.xlu1 %v1432_v50, %s1556_s14  ;;  %v1434_v53 = vpop.eup %1433 }
 0x684   :  { %v1436_v54 = vpop.eup %1435  ;;  %v387_v55 = vadd.f32 1.0, %v1434_v53 }
 0x685   :  { %v388_v56 = vadd.f32 1.0, %v1436_v54 }
 0x686   :  { %1437 = vrcp.f32 %v387_v55 }
 0x687   :  { %1439 = vrcp.f32 %v388_v56 }
 0x690   :  { %v1438_v57 = vpop.eup %1437 }
 0x691   :  { %v1440_v59 = vpop.eup %1439  ;;  %v401_v2 = vmul.f32 %v1438_v57, %v397_v63 }
 0x692   :  { %v402_v4 = vmul.f32 %v1440_v59, %v398_v0 }
 0x6f4   :  { %v406_v58 = vpop.permute.xlu0 %405 }
 0x6f5   :  { %v408_v60 = vpop.permute.xlu1 %407  ;;  %v411_v61 = vmul.f32 %v1438_v57, %v406_v58 }
 0x6f6   :  { %v412_v62 = vmul.f32 %v1440_v59, %v408_v60 }
 0x6f7   :  { %415 = vrot.lane.b32.xlu0 %v411_v61, %s1557_s3 }
 0x6f8   :  { %417 = vrot.lane.b32.xlu1 %v412_v62, %s1557_s3 }
 0x769   :  { %v416_v5 = vpop.permute.xlu0 %415 }
 0x76a   :  { %v418_v6 = vpop.permute.xlu1 %417  ;;  %v1706_v8 = vadd.f32 %v416_v5, %v401_v2 }
 0x76b   :  { %v1708_v9 = vadd.f32 %v418_v6, %v402_v4 }
 0x76c   :  { %1441 = vtanh.f32 %v1706_v8  ;;  %v513_v49 = vrot.slane %v1706_v8, 7 }
 0x76d   :  { %1443 = vtanh.f32 %v1708_v9  ;;  %v514_v50 = vrot.slane %v1708_v9, 7 }
 0x776   :  { %v1442_v10 = vpop.eup %1441 }
 0x777   :  { %v1444_v11 = vpop.eup %1443  ;;  %427 = vrot.lane.b32.xlu0 %v1442_v10, %s1556_s14 }
 0x778   :  { %429 = vrot.lane.b32.xlu1 %v1444_v11, %s1556_s14 }
 0x7e9   :  { %v428_v12 = vpop.permute.xlu0 %427 }
 0x7ea   :  { %v430_v13 = vpop.permute.xlu1 %429  ;;  %v433_v14 = vmul.f32 %v1438_v57, %v428_v12 }
 0x7eb   :  { %v434_v16 = vmul.f32 %v1440_v59, %v430_v13 }
 0x7ec   :  { %v435_v17 = vpack.c.bf16 %v433_v14, %v433_v14 }
 0x7ed   :  { %v436_v19 = vpack.c.bf16 %v434_v16, %v434_v16 }
 0x7ee   :  { %v439_v20 = vunpack.c.l.b16 %v435_v17 }
 0x7ef   :  { %v440_v21 = vunpack.c.l.b16 %v436_v19 }
 0x7f0   :  { %v441_v22 = vrot.slane %v439_v20, 2 }
 0x7f1   :  { %v442_v23 = vrot.slane %v440_v21, 1 }
 0x7f3   :  { %v443_v24 = vsel %vm212_vm3, %v442_v23, %v441_v22 }
 0x7f4   :  { %v444_v25 = vpack.c.b16 %v443_v24, %v443_v24 }
 0x7f6   :  { %445 = vrot.lane.b32.xlu0 %v444_v25, %s1557_s3 }
 0x868   :  { %v446_v26 = vpop.permute.xlu0 %445 }
 0x869   :  { %1319 = vmatmul.mubr.msk.bf16.vlgmr.msra.gmra.mrb[8].mxu0 %vm107_vm4, %v446_v26 }
 0x86a   :  { %1331 = vmatpush3.bf16.msra.mxu0 %v1613_v3  ;;  %1334 = vmatprep.mubr.msk.bf16.mxu0 %vm1554_vm1, %v1553_v1 }
 0x86b   :  { %1332 = vmatprep.subr.bf16.mxu0 %v1553_v1 }
 0x86e   :  { %1333 = vmatpush3.bf16.msra.mxu0 %v1627_v7 }
 0x86f   :  { %1346 = vmatprep.subr.bf16.mxu0 %v1553_v1 }
 0x93c   :  { %v484_v27 = vpop.f32.mrb[8].mxu0 }
 0x93d   :  { %v491_v28 = vrot.slane %v484_v27, 5  ;;  %v492_v29 = vrot.slane %v484_v27, 6  ;;  %v1320_v30 = vpop.f32.mrb[9].mxu0 }
 0x93e   :  { %v487_v31 = vpop.f32.mrb[10].mxu0 }
 0x93f   :  { %v495_v32 = vadd.f32 %v491_v28, %v1652_v18  ;;  %v496_v33 = vadd.f32 %v492_v29, %v1650_v15  ;;  %v1321_v34 = vpop.f32.mrb[11].mxu0 }
 0x941   :  { %1445 = vtanh.f32 %v495_v32  ;;  %v1230_v37 = vmul.f32 -1.442695, %v495_v32  ;;  %v1231_v38 = vmul.f32 -1.442695, %v496_v33 }
 0x942   :  { %1447 = vtanh.f32 %v496_v33 }
 0x943   :  { %1449 = vpow2.f32 %v1230_v37 }
 0x944   :  { %1451 = vpow2.f32 %v1231_v38 }
 0x94b   :  { %v1446_v35 = vpop.eup %1445 }
 0x94c   :  { %v1448_v36 = vpop.eup %1447  ;;  %521 = vrot.lane.b32.xlu1 %v1446_v35, %s1556_s14 }
 0x94d   :  { %523 = vrot.lane.b32.xlu0 %v1448_v36, %s1556_s14  ;;  %v1450_v39 = vpop.eup %1449 }
 0x94e   :  { %v1452_v40 = vpop.eup %1451  ;;  %v503_v41 = vadd.f32 1.0, %v1450_v39 }
 0x94f   :  { %v504_v42 = vadd.f32 1.0, %v1452_v40 }
 0x950   :  { %1453 = vrcp.f32 %v503_v41 }
 0x951   :  { %1455 = vrcp.f32 %v504_v42 }
 0x95a   :  { %v1454_v43 = vpop.eup %1453 }
 0x95b   :  { %v1456_v45 = vpop.eup %1455  ;;  %v517_v51 = vmul.f32 %v1454_v43, %v513_v49 }
 0x95c   :  { %v518_v52 = vmul.f32 %v1456_v45, %v514_v50 }
 0x9be   :  { %v522_v44 = vpop.permute.xlu1 %521 }
 0x9bf   :  { %v524_v46 = vpop.permute.xlu0 %523  ;;  %v527_v47 = vmul.f32 %v1454_v43, %v522_v44 }
 0x9c0   :  { %v528_v48 = vmul.f32 %v1456_v45, %v524_v46 }
 0x9c1   :  { %531 = vrot.lane.b32.xlu1 %v527_v47, %s1557_s3 }
 0x9c2   :  { %533 = vrot.lane.b32.xlu0 %v528_v48, %s1557_s3 }
 0xa33   :  { %v532_v53 = vpop.permute.xlu1 %531 }
 0xa34   :  { %v534_v54 = vpop.permute.xlu0 %533  ;;  %v537_v55 = vadd.f32 %v532_v53, %v517_v51 }
 0xa35   :  { %v538_v56 = vadd.f32 %v534_v54, %v518_v52 }
 0xa36   :  { %1457 = vtanh.f32 %v537_v55  ;;  %v629_v35 = vrot.slane %v537_v55, 7 }
 0xa37   :  { %1459 = vtanh.f32 %v538_v56  ;;  %v630_v36 = vrot.slane %v538_v56, 7 }
 0xa40   :  { %v1458_v57 = vpop.eup %1457 }
 0xa41   :  { %v1460_v58 = vpop.eup %1459  ;;  %543 = vrot.lane.b32.xlu1 %v1458_v57, %s1556_s14 }
 0xa42   :  { %545 = vrot.lane.b32.xlu0 %v1460_v58, %s1556_s14 }
 0xab3   :  { %v544_v59 = vpop.permute.xlu1 %543 }
 0xab4   :  { %v546_v60 = vpop.permute.xlu0 %545  ;;  %v549_v61 = vmul.f32 %v1454_v43, %v544_v59 }
 0xab5   :  { %v550_v62 = vmul.f32 %v1456_v45, %v546_v60 }
 0xab6   :  { %v551_v63 = vpack.c.bf16 %v549_v61, %v549_v61 }
 0xab7   :  { %v552_v0 = vpack.c.bf16 %v550_v62, %v550_v62 }
 0xab8   :  { %v555_v2 = vunpack.c.l.b16 %v551_v63 }
 0xab9   :  { %v556_v4 = vunpack.c.l.b16 %v552_v0 }
 0xaba   :  { %v557_v5 = vrot.slane %v555_v2, 3 }
 0xabb   :  { %v558_v6 = vrot.slane %v556_v4, 2 }
 0xabd   :  { %v559_v8 = vsel %vm212_vm3, %v558_v6, %v557_v5 }
 0xabe   :  { %v560_v9 = vpack.c.b16 %v559_v8, %v559_v8 }
 0xac0   :  { %561 = vrot.lane.b32.xlu1 %v560_v9, %s1557_s3 }
 0xb32   :  { %v562_v10 = vpop.permute.xlu1 %561 }
 0xb33   :  { %1327 = vmatmul.mubr.msk.bf16.vlgmr.msra.gmra.mrb[8].mxu1 %vm107_vm4, %v562_v10 }
 0xb34   :  { %1339 = vmatpush3.bf16.msra.mxu1 %v1613_v3  ;;  %1342 = vmatprep.mubr.msk.bf16.mxu1 %vm1554_vm1, %v1553_v1 }
 0xb35   :  { %1340 = vmatprep.subr.bf16.mxu1 %v1553_v1 }
 0xb38   :  { %1341 = vmatpush3.bf16.msra.mxu1 %v1627_v7 }
 0xc06   :  { %v600_v11 = vpop.f32.mrb[8].mxu1 }
 0xc07   :  { %v607_v12 = vrot.slane %v600_v11, 4  ;;  %v608_v13 = vrot.slane %v600_v11, 5  ;;  %v1328_v14 = vpop.f32.mrb[9].mxu1 }
 0xc08   :  { %v603_v16 = vpop.f32.mrb[10].mxu1 }
 0xc09   :  { %v611_v17 = vadd.f32 %v607_v12, %v1652_v18  ;;  %v612_v19 = vadd.f32 %v608_v13, %v1650_v15  ;;  %v1329_v20 = vpop.f32.mrb[11].mxu1 }
 0xc0b   :  { %1461 = vtanh.f32 %v611_v17  ;;  %v1233_v23 = vmul.f32 -1.442695, %v611_v17  ;;  %v1234_v24 = vmul.f32 -1.442695, %v612_v19 }
 0xc0c   :  { %1463 = vtanh.f32 %v612_v19 }
 0xc0d   :  { %1465 = vpow2.f32 %v1233_v23 }
 0xc0e   :  { %1467 = vpow2.f32 %v1234_v24 }
 0xc15   :  { %v1462_v21 = vpop.eup %1461 }
 0xc16   :  { %v1464_v22 = vpop.eup %1463  ;;  %637 = vrot.lane.b32.xlu0 %v1462_v21, %s1556_s14 }
 0xc17   :  { %639 = vrot.lane.b32.xlu1 %v1464_v22, %s1556_s14  ;;  %v1466_v25 = vpop.eup %1465 }
 0xc18   :  { %v1468_v26 = vpop.eup %1467  ;;  %v619_v27 = vadd.f32 1.0, %v1466_v25 }
 0xc19   :  { %v620_v28 = vadd.f32 1.0, %v1468_v26 }
 0xc1a   :  { %1469 = vrcp.f32 %v619_v27 }
 0xc1b   :  { %1471 = vrcp.f32 %v620_v28 }
 0xc24   :  { %v1470_v29 = vpop.eup %1469 }
 0xc25   :  { %v1472_v31 = vpop.eup %1471  ;;  %v633_v37 = vmul.f32 %v1470_v29, %v629_v35 }
 0xc26   :  { %v634_v38 = vmul.f32 %v1472_v31, %v630_v36 }
 0xc88   :  { %v638_v30 = vpop.permute.xlu0 %637 }
 0xc89   :  { %v640_v32 = vpop.permute.xlu1 %639  ;;  %v643_v33 = vmul.f32 %v1470_v29, %v638_v30 }
 0xc8a   :  { %v644_v34 = vmul.f32 %v1472_v31, %v640_v32 }
 0xc8b   :  { %647 = vrot.lane.b32.xlu0 %v643_v33, %s1557_s3 }
 0xc8c   :  { %649 = vrot.lane.b32.xlu1 %v644_v34, %s1557_s3 }
 0xcfd   :  { %v648_v39 = vpop.permute.xlu0 %647 }
 0xcfe   :  { %v650_v40 = vpop.permute.xlu1 %649  ;;  %v653_v41 = vadd.f32 %v648_v39, %v633_v37 }
 0xcff   :  { %v654_v42 = vadd.f32 %v650_v40, %v634_v38 }
 0xd00   :  { %1473 = vtanh.f32 %v653_v41  ;;  %v745_v19 = vrot.slane %v653_v41, 7 }
 0xd01   :  { %1475 = vtanh.f32 %v654_v42  ;;  %v746_v20 = vrot.slane %v654_v42, 7 }
 0xd0a   :  { %v1474_v43 = vpop.eup %1473 }
 0xd0b   :  { %v1476_v44 = vpop.eup %1475  ;;  %659 = vrot.lane.b32.xlu0 %v1474_v43, %s1556_s14 }
 0xd0c   :  { %661 = vrot.lane.b32.xlu1 %v1476_v44, %s1556_s14 }
 0xd7d   :  { %v660_v45 = vpop.permute.xlu0 %659 }
 0xd7e   :  { %v662_v46 = vpop.permute.xlu1 %661  ;;  %v665_v47 = vmul.f32 %v1470_v29, %v660_v45 }
 0xd7f   :  { %v666_v48 = vmul.f32 %v1472_v31, %v662_v46 }
 0xd80   :  { %v667_v49 = vpack.c.bf16 %v665_v47, %v665_v47 }
 0xd81   :  { %v668_v50 = vpack.c.bf16 %v666_v48, %v666_v48 }
 0xd82   :  { %v671_v51 = vunpack.c.l.b16 %v667_v49 }
 0xd83   :  { %v672_v52 = vunpack.c.l.b16 %v668_v50 }
 0xd84   :  { %v673_v53 = vrot.slane %v671_v51, 4 }
 0xd85   :  { %v674_v54 = vrot.slane %v672_v52, 3 }
 0xd87   :  { %v675_v55 = vsel %vm212_vm3, %v674_v54, %v673_v53 }
 0xd88   :  { %v676_v56 = vpack.c.b16 %v675_v55, %v675_v55 }
 0xd8a   :  { %677 = vrot.lane.b32.xlu0 %v676_v56, %s1557_s3 }
 0xdfc   :  { %v678_v57 = vpop.permute.xlu0 %677 }
 0xdfd   :  { %1335 = vmatmul.mubr.msk.bf16.vlgmr.msra.gmra.mrb[12].mxu0 %vm107_vm4, %v678_v57 }
 0xdfe   :  { %1347 = vmatpush3.bf16.msra.mxu0 %v1613_v3  ;;  %1350 = vmatprep.mubr.msk.bf16.mxu0 %vm1554_vm1, %v1553_v1 }
 0xdff   :  { %1348 = vmatprep.subr.bf16.mxu0 %v1553_v1 }
 0xe02   :  { %1349 = vmatpush3.bf16.msra.mxu0 %v1627_v7 }
 0xed0   :  { %v716_v58 = vpop.f32.mrb[12].mxu0 }
 0xed1   :  { %v723_v59 = vrot.slane %v716_v58, 3  ;;  %v724_v60 = vrot.slane %v716_v58, 4  ;;  %v1336_v61 = vpop.f32.mrb[13].mxu0 }
 0xed2   :  { %v719_v62 = vpop.f32.mrb[14].mxu0 }
 0xed3   :  { %v727_v63 = vadd.f32 %v723_v59, %v1652_v18  ;;  %v728_v0 = vadd.f32 %v724_v60, %v1650_v15  ;;  %v1337_v2 = vpop.f32.mrb[15].mxu0 }
 0xed5   :  { %1477 = vtanh.f32 %v727_v63  ;;  %v1236_v5 = vmul.f32 -1.442695, %v727_v63  ;;  %v1237_v7 = vmul.f32 -1.442695, %v728_v0 }
 0xed6   :  { %1479 = vtanh.f32 %v728_v0 }
 0xed7   :  { %1481 = vpow2.f32 %v1236_v5 }
 0xed8   :  { %1483 = vpow2.f32 %v1237_v7 }
 0xedf   :  { %v1478_v3 = vpop.eup %1477 }
 0xee0   :  { %v1480_v4 = vpop.eup %1479  ;;  %753 = vrot.lane.b32.xlu1 %v1478_v3, %s1556_s14 }
 0xee1   :  { %755 = vrot.lane.b32.xlu0 %v1480_v4, %s1556_s14  ;;  %v1482_v6 = vpop.eup %1481 }
 0xee2   :  { %v1484_v8 = vpop.eup %1483  ;;  %v735_v9 = vadd.f32 1.0, %v1482_v6 }
 0xee3   :  { %v736_v10 = vadd.f32 1.0, %v1484_v8 }
 0xee4   :  { %1485 = vrcp.f32 %v735_v9 }
 0xee5   :  { %1487 = vrcp.f32 %v736_v10 }
 0xeee   :  { %v1486_v11 = vpop.eup %1485 }
 0xeef   :  { %v1488_v13 = vpop.eup %1487  ;;  %v749_v21 = vmul.f32 %v1486_v11, %v745_v19 }
 0xef0   :  { %v750_v22 = vmul.f32 %v1488_v13, %v746_v20 }
 0xf52   :  { %v754_v12 = vpop.permute.xlu1 %753 }
 0xf53   :  { %v756_v14 = vpop.permute.xlu0 %755  ;;  %v759_v16 = vmul.f32 %v1486_v11, %v754_v12 }
 0xf54   :  { %v760_v17 = vmul.f32 %v1488_v13, %v756_v14 }
 0xf55   :  { %763 = vrot.lane.b32.xlu1 %v759_v16, %s1557_s3 }
 0xf56   :  { %765 = vrot.lane.b32.xlu0 %v760_v17, %s1557_s3 }
 0xfc7   :  { %v764_v23 = vpop.permute.xlu1 %763 }
 0xfc8   :  { %v766_v24 = vpop.permute.xlu0 %765  ;;  %v769_v25 = vadd.f32 %v764_v23, %v749_v21 }
 0xfc9   :  { %v770_v26 = vadd.f32 %v766_v24, %v750_v22 }
 0xfca   :  { %1489 = vtanh.f32 %v769_v25  ;;  %v861_v0 = vrot.slane %v769_v25, 7 }
 0xfcb   :  { %1491 = vtanh.f32 %v770_v26  ;;  %v862_v2 = vrot.slane %v770_v26, 7 }
 0xfd4   :  { %v1490_v27 = vpop.eup %1489 }
 0xfd5   :  { %v1492_v28 = vpop.eup %1491  ;;  %775 = vrot.lane.b32.xlu1 %v1490_v27, %s1556_s14 }
 0xfd6   :  { %777 = vrot.lane.b32.xlu0 %v1492_v28, %s1556_s14 }
0x1047   :  { %v776_v29 = vpop.permute.xlu1 %775 }
0x1048   :  { %v778_v30 = vpop.permute.xlu0 %777  ;;  %v781_v31 = vmul.f32 %v1486_v11, %v776_v29 }
0x1049   :  { %v782_v32 = vmul.f32 %v1488_v13, %v778_v30 }
0x104a   :  { %v783_v33 = vpack.c.bf16 %v781_v31, %v781_v31 }
0x104b   :  { %v784_v34 = vpack.c.bf16 %v782_v32, %v782_v32 }
0x104c   :  { %v787_v35 = vunpack.c.l.b16 %v783_v33 }
0x104d   :  { %v788_v36 = vunpack.c.l.b16 %v784_v34 }
0x104e   :  { %v789_v37 = vrot.slane %v787_v35, 5 }
0x104f   :  { %v790_v38 = vrot.slane %v788_v36, 4 }
0x1051   :  { %v791_v39 = vsel %vm212_vm3, %v790_v38, %v789_v37 }
0x1052   :  { %v792_v40 = vpack.c.b16 %v791_v39, %v791_v39 }
0x1054   :  { %793 = vrot.lane.b32.xlu1 %v792_v40, %s1557_s3 }
0x10c6   :  { %v794_v41 = vpop.permute.xlu1 %793 }
0x10c7   :  { %1343 = vmatmul.mubr.msk.bf16.vlgmr.msra.gmra.mrb[12].mxu1 %vm107_vm4, %v794_v41 }
0x10c8   :  { %1362 = vmatprep.mubr.msk.f32.mxu1 %vm1554_vm1, %v1553_v1 }
0x119a   :  { %v832_v42 = vpop.f32.mrb[12].mxu1 }
0x119b   :  { %v839_v43 = vrot.slane %v832_v42, 2  ;;  %v840_v44 = vrot.slane %v832_v42, 3  ;;  %v1344_v45 = vpop.f32.mrb[13].mxu1 }
0x119c   :  { %v835_v46 = vpop.f32.mrb[14].mxu1 }
0x119d   :  { %v843_v47 = vadd.f32 %v839_v43, %v1652_v18  ;;  %v844_v48 = vadd.f32 %v840_v44, %v1650_v15  ;;  %v1345_v49 = vpop.f32.mrb[15].mxu1 }
0x119f   :  { %1493 = vtanh.f32 %v843_v47  ;;  %v1239_v52 = vmul.f32 -1.442695, %v843_v47  ;;  %v1240_v53 = vmul.f32 -1.442695, %v844_v48 }
0x11a0   :  { %1495 = vtanh.f32 %v844_v48 }
0x11a1   :  { %1497 = vpow2.f32 %v1239_v52 }
0x11a2   :  { %1499 = vpow2.f32 %v1240_v53  ;;  %v1015_v53 = vld [vmem:[%s1844_s4] sm:$0xff] }
0x11a9   :  { %v1494_v50 = vpop.eup %1493 }
0x11aa   :  { %v1496_v51 = vpop.eup %1495  ;;  %869 = vrot.lane.b32.xlu0 %v1494_v50, %s1556_s14 }
0x11ab   :  { %871 = vrot.lane.b32.xlu1 %v1496_v51, %s1556_s14  ;;  %v1498_v54 = vpop.eup %1497 }
0x11ac   :  { %v1500_v55 = vpop.eup %1499  ;;  %v851_v56 = vadd.f32 1.0, %v1498_v54  ;;  %v1016_v54 = vld [vmem:[%s1844_s4 + $0x8] sm:$0xff] }
0x11ad   :  { %v852_v57 = vadd.f32 1.0, %v1500_v55  ;;  %v1017_v55 = vld [vmem:[%s1844_s4 + $0x10] sm:$0xff] }
0x11ae   :  { %1501 = vrcp.f32 %v851_v56  ;;  %v1558_v56 = vmov 0.0|0.0  }
0x11af   :  { %1503 = vrcp.f32 %v852_v57  ;;  %1376 = vmatprep.subr.bf16.mxu1 %v1558_v56  ;;  %v1377_v57 = vpack.c.bf16 %v1016_v54, %v1015_v53  ;;  %1382 = vmatprep.subr.bf16.mxu0 %v1558_v56 }
0x11b1   :  { %1378 = vmatpush3.bf16.msra.mxu1 %v1377_v57 }
0x11b2   :  { %1379 = vmatprep.subr.bf16.mxu1 %v1558_v56 }
0x11b8   :  { %v1502_v58 = vpop.eup %1501 }
0x11b9   :  { %v1504_v60 = vpop.eup %1503  ;;  %v865_v3 = vmul.f32 %v1502_v58, %v861_v0 }
0x11ba   :  { %v866_v4 = vmul.f32 %v1504_v60, %v862_v2 }
0x121c   :  { %v870_v59 = vpop.permute.xlu0 %869 }
0x121d   :  { %v872_v61 = vpop.permute.xlu1 %871  ;;  %v875_v62 = vmul.f32 %v1502_v58, %v870_v59 }
0x121e   :  { %v876_v63 = vmul.f32 %v1504_v60, %v872_v61 }
0x121f   :  { %879 = vrot.lane.b32.xlu0 %v875_v62, %s1557_s3  ;;  %v1106_v62 = vld [vmem:[%s1846_s6] sm:$0xff] }
0x1220   :  { %881 = vrot.lane.b32.xlu1 %v876_v63, %s1557_s3  ;;  %v1107_v63 = vld [vmem:[%s1846_s6 + $0x8] sm:$0xff] }
0x1221   :  { %v1383_v0 = vpack.c.bf16 %v1107_v63, %v1106_v62 }
0x1291   :  { %v880_v5 = vpop.permute.xlu0 %879 }
0x1292   :  { %v882_v7 = vpop.permute.xlu1 %881  ;;  %v885_v6 = vadd.f32 %v880_v5, %v865_v3 }
0x1293   :  { %v886_v8 = vadd.f32 %v882_v7, %v866_v4 }
0x1294   :  { %1505 = vtanh.f32 %v885_v6  ;;  %v977_v45 = vrot.slane %v885_v6, 7 }
0x1295   :  { %1507 = vtanh.f32 %v886_v8  ;;  %v978_v46 = vrot.slane %v886_v8, 7 }
0x129e   :  { %v1506_v9 = vpop.eup %1505 }
0x129f   :  { %v1508_v10 = vpop.eup %1507  ;;  %891 = vrot.lane.b32.xlu0 %v1506_v9, %s1556_s14 }
0x12a0   :  { %893 = vrot.lane.b32.xlu1 %v1508_v10, %s1556_s14  ;;  %v1108_v10 = vld [vmem:[%s1846_s6 + $0x10] sm:$0xff] }
0x1311   :  { %v892_v11 = vpop.permute.xlu0 %891 }
0x1312   :  { %v894_v12 = vpop.permute.xlu1 %893  ;;  %v897_v13 = vmul.f32 %v1502_v58, %v892_v11  ;;  %v1018_v58 = vld [vmem:[%s1844_s4 + $0x18] sm:$0xff] }
0x1313   :  { %v898_v14 = vmul.f32 %v1504_v60, %v894_v12  ;;  %v1380_v59 = vpack.c.bf16 %v1018_v58, %v1017_v55  ;;  %v1109_v11 = vld [vmem:[%s1846_s6 + $0x18] sm:$0xff] }
0x1314   :  { %v899_v16 = vpack.c.bf16 %v897_v13, %v897_v13  ;;  %v1386_v12 = vpack.c.bf16 %v1109_v11, %v1108_v10  ;;  %v1244_v13 = vld [vmem:[%s1845_s5] ss:$0 sm:$0xff]  ;;  %s1559_s5 = smov [#allocation2]  }
0x1315   :  { %v900_v17 = vpack.c.bf16 %v898_v14, %v898_v14  ;;  %1381 = vmatpush3.bf16.msra.mxu1 %v1380_v59  ;;  %s1209_s6 = sshll.u32 %s1559_s5, 4  ;;  %s1210_s6 = int_to_ptr.vmem [resolvable:$true] %s1209_s6 }
0x1316   :  { %v903_v19 = vunpack.c.l.b16 %v899_v16  ;;  %p1534_p1 = scmp.lt.s32.totalorder %s1210_s6, %s1210_s6 }
0x1317   :  { %v904_v20 = vunpack.c.l.b16 %v900_v17 }
0x1318   :  { %v905_v21 = vrot.slane %v903_v19, 6 }
0x1319   :  { %v906_v22 = vrot.slane %v904_v20, 5  ;;  %v1246_v20 = vld [vmem:[%s1847_s7] ss:$0 sm:$0xff]  ;;  %s1529_s7 = scalar_lea.vmem %s1210_s6, 32 }
0x131a   :  { %p1530_p0 = scmp.ne.s32.totalorder %s1210_s6, %s1529_s7  ;;  %p1535_p2 = scmp.lt.s32.totalorder %s1529_s7, %s1529_s7 }
0x131b   :  { %v907_v23 = vsel %vm212_vm3, %v906_v22, %v905_v21 }
0x131c   :  { %v908_v24 = vpack.c.b16 %v907_v23, %v907_v23  ;;  %p1536_p3 = por %p1535_p2, %p1534_p1 }
0x131e   :  { %909 = vrot.lane.b32.xlu0 %v908_v24, %s1557_s3  ;;  %p1537_p4 = pnand %p1536_p3, %p1530_p0 }
0x1390   :  { %v910_v25 = vpop.permute.xlu0 %909 }
0x1391   :  { %1351 = vmatmul.mubr.msk.bf16.vlgmr.msra.gmra.mrb[16].mxu0 %vm107_vm4, %v910_v25 }
0x1392   :  { %1373 = vmatprep.mubr.msk.f32.mxu0 %vm1554_vm1, %v1553_v1  ;;  %1384 = vmatpush3.bf16.msra.mxu0 %v1383_v0 }
0x1393   :  { %1385 = vmatprep.subr.bf16.mxu0 %v1558_v56 }
0x1396   :  { %1387 = vmatpush3.bf16.msra.mxu0 %v1386_v12 }
0x1464   :  { %v948_v26 = vpop.f32.mrb[16].mxu0 }
0x1465   :  { %v955_v27 = vrot.slane %v948_v26, 1  ;;  %v956_v28 = vrot.slane %v948_v26, 2  ;;  %v1352_v29 = vpop.f32.mrb[17].mxu0 }
0x1466   :  { %v951_v30 = vpop.f32.mrb[18].mxu0 }
0x1467   :  { %v959_v31 = vadd.f32 %v955_v27, %v1652_v18  ;;  %v960_v32 = vadd.f32 %v956_v28, %v1650_v15  ;;  %v1353_v33 = vpop.f32.mrb[19].mxu0 }
0x1469   :  { %1509 = vtanh.f32 %v959_v31  ;;  %v1242_v36 = vmul.f32 -1.442695, %v959_v31  ;;  %v1243_v1 = vmul.f32 -1.442695, %v960_v32 }
0x146a   :  { %1511 = vtanh.f32 %v960_v32 }
0x146b   :  { %1513 = vpow2.f32 %v1242_v36 }
0x146c   :  { %1515 = vpow2.f32 %v1243_v1 }
0x1473   :  { %v1510_v34 = vpop.eup %1509 }
0x1474   :  { %v1512_v35 = vpop.eup %1511  ;;  %985 = vrot.lane.b32.xlu1 %v1510_v34, %s1556_s14 }
0x1475   :  { %987 = vrot.lane.b32.xlu0 %v1512_v35, %s1556_s14  ;;  %v1514_v37 = vpop.eup %1513 }
0x1476   :  { %v1516_v38 = vpop.eup %1515  ;;  %v967_v39 = vadd.f32 1.0, %v1514_v37 }
0x1477   :  { %v968_v40 = vadd.f32 1.0, %v1516_v38 }
0x1478   :  { %1517 = vrcp.f32 %v967_v39 }
0x1479   :  { %1519 = vrcp.f32 %v968_v40 }
0x1482   :  { %v1518_v15 = vpop.eup %1517 }
0x1483   :  { %v1520_v41 = vpop.eup %1519  ;;  %v981_v47 = vmul.f32 %v1518_v15, %v977_v45 }
0x1484   :  { %v982_v48 = vmul.f32 %v1520_v41, %v978_v46 }
0x14e6   :  { %v986_v18 = vpop.permute.xlu1 %985 }
0x14e7   :  { %v988_v42 = vpop.permute.xlu0 %987  ;;  %v991_v43 = vmul.f32 %v1518_v15, %v986_v18 }
0x14e8   :  { %v992_v44 = vmul.f32 %v1520_v41, %v988_v42 }
0x14e9   :  { %995 = vrot.lane.b32.xlu1 %v991_v43, %s1557_s3 }
0x14ea   :  { %997 = vrot.lane.b32.xlu0 %v992_v44, %s1557_s3 }
0x155b   :  { %v996_v49 = vpop.permute.xlu1 %995 }
0x155c   :  { %v998_v50 = vpop.permute.xlu0 %997  ;;  %v1001_v51 = vadd.f32 %v996_v49, %v981_v47 }
0x155d   :  { %v1002_v52 = vadd.f32 %v998_v50, %v982_v48 }
0x155e   :  { %1521 = vtanh.f32 %v1001_v51 }
0x155f   :  { %1523 = vtanh.f32 %v1002_v52 }
0x1568   :  { %v1522_v60 = vpop.eup %1521 }
0x1569   :  { %v1524_v61 = vpop.eup %1523  ;;  %1007 = vrot.lane.b32.xlu1 %v1522_v60, %s1556_s14 }
0x156a   :  { %1009 = vrot.lane.b32.xlu0 %v1524_v61, %s1556_s14 }
0x15db   :  { %v1008_v2 = vpop.permute.xlu1 %1007 }
0x15dc   :  { %v1010_v3 = vpop.permute.xlu0 %1009  ;;  %v1013_v4 = vmul.f32 %v1518_v15, %v1008_v2 }
0x15dd   :  { %v1014_v5 = vmul.f32 %v1520_v41, %v1010_v3 }
0x15de   :  { %v1028_v7 = vrot.slane %v1013_v4, 7 }
0x15df   :  { %v1029_v6 = vrot.slane %v1014_v5, 6 }
0x15e1   :  { %v1030_v8 = vsel %vm212_vm3, %v1029_v6, %v1028_v7 }
0x15e2   :  { %1031 = vrot.lane.b32.xlu1 %v1030_v8, %s1557_s3 }
0x1654   :  { %v1032_v9 = vpop.permute.xlu1 %1031 }
0x1655   :  { %1363 = vmatmul.mubr.msk.f32.vlgmr.msra.gmra.mrb[16].mxu1 %vm107_vm4, %v1032_v9 }
0x1728   :  { %v1101_v14 = vpop.f32.mrb[16].mxu1 }
0x1729   :  { %v1102_v16 = vadd.f32 %v1244_v13, %v1101_v14  ;;  %v1364_v17 = vpop.f32.mrb[17].mxu1 }
0x172b   :  { %v1105_v19 = vmax.f32 %v1102_v16, 0.0 }
0x172d   :  { %1374 = vmatmul.mubr.msk.f32.vlgmr.msra.gmra.mrb[20].mxu0 %vm107_vm4, %v1105_v19 }
0x1800   :  { %v1186_v21 = vpop.f32.mrb[20].mxu0 }
0x1801   :  { %v1187_v22 = vadd.f32 %v1246_v20, %v1186_v21  ;;  %v1375_v23 = vpop.f32.mrb[21].mxu0 }
0x1803   :  { %v1191_v24 = vsel %vm1190_vm5, %v1187_v22, -inf }
0x1804   :  { %1192 = vmax.xlane.f32.xlu0 %v1191_v24 }
0x1891   :  { %v1193_v25 = vpop.xlane.xlu0 %1192 }
0x1892   :  { %v1194_v26 = vsub.f32 %v1187_v22, %v1193_v25 }
0x1894   :  { %v1195_v27 = vmul.f32 1.442695, %v1194_v26 }
0x1896   :  { %1525 = vpow2.f32 %v1195_v27 }
0x18a0   :  { %v1526_v28 = vpop.eup %1525 }
0x18a1   :  { %v1197_v29 = vsel %vm1190_vm5, %v1526_v28, 0.0 }
0x18a2   :  { %1198 = vadd.xlane.f32.xlu1 %v1197_v29 }
0x192f   :  { %v1199_v30 = vpop.xlane.xlu1 %1198 }
0x1930   :  { %1527 = vrcp.f32 %v1199_v30 }
0x193a   :  { %v1528_v31 = vpop.eup %1527 }
0x193b   :  { %v1201_v32 = vmul.f32 %v1528_v31, %v1526_v28 }
0x193d   :  { %1202 = vst.msk [vmem:[#allocation2] sm:$0x3] %vm1190_vm5, %v1201_v32 }
0x193e   :  { %1540 = shalt.err (!%p1537_p4)
}
0x193f   :  { %s1541_s13 = scalar_lea.hbm %s1848_s8, 32 }
0x1940   :  { %p1542_p5 = scmp.ne.s32.totalorder %s1848_s8, %s1541_s13  ;;  %p1545_p6 = scmp.lt.u32.totalorder %s1541_s13, %s1848_s8 }
0x1942   :  { %p1547_p7 = pnand %p1545_p6, %p1542_p5 }
0x1944   :  { %1550 = shalt.err (!%p1547_p7)
}
0x1945   :  { %1212 = dma.vmem_to_hbm [thread:$0]  %s1210_s6, 32, %s1848_s8, [#allocation3]  }
0x1946   :  { %1551 = dma.done.wait [#allocation3], 32  }
0x1947   :  { %1552 = vsyncadd [#allocation3], 4294967264 }
0x1948   :  { %1216 = vsyncpa [#allocation3], 1 }

</bundles_post_ra>
